<compile_context>
chip_gen: v7x
topology: tpu7x:2x2x1
jax: 0.10.0
libtpu: 0.0.40
codegen_flags: <defaults>
</compile_context>

<pallas_src>
import math
from functools import partial

import jax
import jax.numpy as jnp
from jax.experimental import pallas as pl
from jax.experimental.pallas import tpu as pltpu


HIDDEN = 50      # conv1/conv2 out channels in the PyTorch module (fc4 in = 4*50)
CPAD = 128       # lane-padded hidden width
NCLS = 4         # real number of classes
NCLSP = 128      # lane-padded class width of the kernel output


def _round_up(v, m):
    return ((v + m - 1) // m) * m


# ----------------------------------------------------------------------------
# in-kernel helpers (traced inside the single fused kernel)
# ----------------------------------------------------------------------------
def _gcn(adj, x, w, b):
    """GCNConv: D^-1/2 (A+I) D^-1/2 (X W) + b with the normalization folded
    onto XW; never materializes I or the normalized adjacency.  The O(n^2*C)
    aggregation matmul runs bf16 x bf16 -> f32 on the MXU (adj is 0/1 so the
    cast is exact); the correction term and bias stay f32."""
    n = x.shape[0]
    xw = jnp.dot(x, w, preferred_element_type=jnp.float32)                 # [n, C] f32
    adj_b = adj.astype(jnp.bfloat16)                                       # 0/1 -> exact
    deg = jnp.dot(adj_b, jnp.ones((n, 1), jnp.bfloat16),
                  preferred_element_type=jnp.float32) + 1.0                # [n, 1] exact rowsum (MXU)
    d = jax.lax.rsqrt(deg)
    msg = jnp.dot(adj_b, (d * xw).astype(jnp.bfloat16),
                  preferred_element_type=jnp.float32)                      # dominant matmul, bf16 MXU
    return d * msg + (d * d) * xw + b


def _topk_pool(x, adj, p_col, k, with_adj=True):
    """TopKPooling: score = tanh(x @ p_col) (1/||p|| folded into p host-side),
    keep the k best nodes gated by their score plus the induced sub-adjacency.
    Single pairwise-comparison matrix, one one-hot selection matrix; gather and
    score gating are fused into MXU matmuls (no dynamic indexing)."""
    n = x.shape[0]
    s_col = jnp.tanh(jnp.dot(x, p_col, preferred_element_type=jnp.float32))  # [n, 1]  (MXU)

    ii = jax.lax.broadcasted_iota(jnp.int32, (n, n), 0)
    jj = jax.lax.broadcasted_iota(jnp.int32, (n, n), 1)
    # Exact [n,1] -> [1,n] relayout of the score (must be bit-exact for the
    # strict-total-order tie-break); reuses the iotas needed below.
    # TODO(synk): swap for jnp.transpose / pltpu.einshape (O(n)) once verified.
    s_row = jnp.sum(jnp.where(ii == jj, s_col, 0.0), axis=0, keepdims=True)   # [1, n]

    # rank[j] = #nodes that beat j (ties broken by lower index) — one matrix only
    beats = (s_col > s_row) | ((s_col == s_row) & (ii < jj))                  # [n, n] "i beats j"
    rank_row = jnp.sum(beats.astype(jnp.float32), axis=0, keepdims=True)      # [1, n]

    r_iota = jax.lax.broadcasted_iota(jnp.int32, (k, n), 0).astype(jnp.float32)
    sel = (r_iota == rank_row).astype(jnp.float32)                            # [k, n] one-hot per rank

    # gather + score gating fused into the selection matmul
    x_p = jnp.dot(sel * s_row, x, preferred_element_type=jnp.float32)         # [k, C]
    if not with_adj:
        return x_p, None

    # adj_pool = (S @ A) @ S^T ; S and the intermediate are exact 0/1 -> bf16 exact
    sel_b = sel.astype(jnp.bfloat16)
    sa = jnp.dot(sel_b, adj.astype(jnp.bfloat16),
                 preferred_element_type=jnp.float32)                          # [k, n]
    adj_p = jax.lax.dot_general(sa.astype(jnp.bfloat16), sel_b,
                                (((1,), (1,)), ((), ())),
                                preferred_element_type=jnp.float32)           # [k, k] = A·Bᵀ on MXU
    return x_p, adj_p


# ----------------------------------------------------------------------------
# the single fused kernel
# ----------------------------------------------------------------------------
def _fused_kernel(k1, k2, ncls,
                  x_ref, adj_ref, w1_ref, b1_ref, w2_ref, b2_ref,
                  p1_ref, p2_ref, wf_ref, bf_ref, o_ref):
    x = x_ref[...]
    adj = adj_ref[...]                                                    # bf16 0/1

    # conv1
    x1 = _gcn(adj, x, w1_ref[...], b1_ref[...])                           # [N,  CPAD]
    # pool1 (+ score gating)
    x1p, adj1 = _topk_pool(x1, adj, p1_ref[...], k1)                      # [k1, CPAD], [k1, k1]
    # conv2 on pooled graph
    x2 = _gcn(adj1, x1p, w2_ref[...], b2_ref[...])                        # [k1, CPAD]
    # readout 1 (gmp / gap over nodes)
    mx1 = jnp.max(x1p, axis=0, keepdims=True)
    mn1 = jnp.mean(x1p, axis=0, keepdims=True)
    # pool2 (its sub-adjacency is never used afterwards)
    x2p, _ = _topk_pool(x2, adj1, p2_ref[...], k2, with_adj=False)        # [k2, CPAD]
    # readout 2
    mx2 = jnp.max(x2p, axis=0, keepdims=True)
    mn2 = jnp.mean(x2p, axis=0, keepdims=True)

    # fc4 on cat([gmp1, gap1, gmp2, gap2]) as ONE MXU matmul (lane concat)
    r = jnp.concatenate([mx1, mn1, mx2, mn2], axis=1)                     # [1, 4*CPAD]
    z = jnp.dot(r, wf_ref[...], preferred_element_type=jnp.float32) + bf_ref[...]

    # log_softmax over the real classes only (padded lanes masked out)
    lane = jax.lax.broadcasted_iota(jnp.int32, z.shape, 1)
    z = jnp.where(lane < ncls, z, -1e30)
    z = z - jnp.max(z, axis=-1, keepdims=True)
    o_ref[...] = z - jnp.log(jnp.sum(jnp.exp(z), axis=-1, keepdims=True))


def _vmem_limit_bytes(n, fpad):
    # inputs + dominant temporaries (beats/sel/adj, node features), x2 headroom
    est = 4 * (n * fpad + 4 * n * n + 10 * n * CPAD + fpad * CPAD
               + CPAD * CPAD + 4 * CPAD * NCLSP + 8 * CPAD)
    return int(min(max(2 * est, 16 << 20), 48 << 20))   # cap below v7x physical VMEM


def forward(x, adj, pp, pooling_ratio=0.5):
    """Full forward pass as one fused pallas_call. `pp` are the padded params."""
    n = x.shape[0]
    k1 = int(math.ceil(pooling_ratio * n))
    k2 = int(math.ceil(pooling_ratio * k1))
    fpad = pp["w1"].shape[0]
    x_pad = jnp.pad(x, ((0, 0), (0, fpad - x.shape[1])))     # lane-align the feature dim
    adj_b = adj.astype(jnp.bfloat16)                          # 0/1 -> exact, halves adj VMEM
    vmem = pl.BlockSpec(memory_space=pltpu.MemorySpace.VMEM)
    out = pl.pallas_call(
        partial(_fused_kernel, k1, k2, NCLS),
        out_shape=jax.ShapeDtypeStruct((1, NCLSP), jnp.float32),
        in_specs=[vmem] * 10,
        out_specs=vmem,
        compiler_params=pltpu.CompilerParams(
            vmem_limit_bytes=_vmem_limit_bytes(n, fpad)),
    )(x_pad, adj_b, pp["w1"], pp["b1"], pp["w2"], pp["b2"],
      pp["p1"], pp["p2"], pp["wf"], pp["bf"])
    return out[:, :NCLS]


# ----------------------------------------------------------------------------
# parameter construction (logical 50-wide params + lane padding to 128)
# ----------------------------------------------------------------------------
def init_params(key, num_features, hidden=HIDDEN, num_classes=NCLS):
    ks = jax.random.split(key, 6)
    return {
        "w1": 0.1 * jax.random.normal(ks[0], (num_features, hidden), jnp.float32),
        "b1": jnp.zeros((1, hidden), jnp.float32),
        "w2": 0.1 * jax.random.normal(ks[1], (hidden, hidden), jnp.float32),
        "b2": jnp.zeros((1, hidden), jnp.float32),
        "p1": 0.1 * jax.random.normal(ks[2], (1, hidden), jnp.float32),
        "p2": 0.1 * jax.random.normal(ks[3], (1, hidden), jnp.float32),
        "wf": 0.1 * jax.random.normal(ks[4], (4 * hidden, num_classes), jnp.float32),
        "bf": 0.01 * jax.random.normal(ks[5], (1, num_classes), jnp.float32),
    }


def pad_params(params):
    """Lane-pad hidden 50 -> 128 and features -> multiple of 128, pre-normalize
    the pooling projections (stored as columns for the MXU score matmul), and
    re-lay out fc4 weights per 128-wide block.  Padded lanes are zero, so the
    padded model is numerically identical to the original one."""
    h = HIDDEN
    f = params["w1"].shape[0]
    fpad = _round_up(f, 128)

    w1 = jnp.zeros((fpad, CPAD), jnp.float32).at[:f, :h].set(params["w1"])
    b1 = jnp.zeros((1, CPAD), jnp.float32).at[:, :h].set(params["b1"])
    w2 = jnp.zeros((CPAD, CPAD), jnp.float32).at[:h, :h].set(params["w2"])
    b2 = jnp.zeros((1, CPAD), jnp.float32).at[:, :h].set(params["b2"])

    def norm_pad_col(p):  # fold 1/||p|| (with eps) into p, store as a [CPAD,1] column
        p_hat = p / jnp.sqrt(jnp.sum(p * p) + 1e-12)
        return jnp.zeros((CPAD, 1), jnp.float32).at[:h, 0].set(p_hat[0])

    p1 = norm_pad_col(params["p1"])
    p2 = norm_pad_col(params["p2"])

    wf = jnp.zeros((4 * CPAD, NCLSP), jnp.float32)
    for blk in range(4):  # [gmp1 | gap1 | gmp2 | gap2] block layout
        wf = wf.at[blk * CPAD:blk * CPAD + h, :NCLS].set(
            params["wf"][blk * h:(blk + 1) * h, :])
    bf = jnp.zeros((1, NCLSP), jnp.float32).at[:, :NCLS].set(params["bf"])

    return dict(w1=w1, b1=b1, w2=w2, b2=b2, p1=p1, p2=p2, wf=wf, bf=bf)


# ----------------------------------------------------------------------------
# pure-JAX reference (mirrors the PyTorch module) for validation
# ----------------------------------------------------------------------------
def reference_forward(x, adj, params, pooling_ratio=0.5):
    def gcn(adj_, x_, w, b):
        n_ = adj_.shape[0]
        a_t = adj_ + jnp.eye(n_, dtype=adj_.dtype)
        deg = jnp.sum(a_t, axis=1, keepdims=True)
        d = 1.0 / jnp.sqrt(deg)
        a_hat = d * a_t * d.T
        return a_hat @ (x_ @ w) + b

    def pool(x_, adj_, p, k):
        s = jnp.tanh(jnp.sum(x_ * p, axis=-1) / jnp.sqrt(jnp.sum(p * p)))
        _, perm = jax.lax.top_k(s, k)
        return x_[perm] * s[perm][:, None], adj_[perm][:, perm]

    n = x.shape[0]
    k1 = int(math.ceil(pooling_ratio * n))
    k2 = int(math.ceil(pooling_ratio * k1))
    x1 = gcn(adj, x, params["w1"], params["b1"])
    x1p, adj1 = pool(x1, adj, params["p1"], k1)
    x2 = gcn(adj1, x1p, params["w2"], params["b2"])
    r1 = jnp.concatenate([jnp.max(x1p, axis=0, keepdims=True),
                          jnp.mean(x1p, axis=0, keepdims=True)], axis=1)
    x2p, _ = pool(x2, adj1, params["p2"], k2)
    r2 = jnp.concatenate([jnp.max(x2p, axis=0, keepdims=True),
                          jnp.mean(x2p, axis=0, keepdims=True)], axis=1)
    xx = jnp.concatenate([r1, r2], axis=1)
    z = xx @ params["wf"] + params["bf"]
    return jax.nn.log_softmax(z, axis=-1)


if __name__ == "__main__":
    key = jax.random.PRNGKey(0)
    k_x, k_a, k_p = jax.random.split(key, 3)

    N = 16    # graph nodes (small)
    F = 116   # num_features (module default)

    # node features
    x = jax.random.normal(k_x, (N, F), jnp.float32)

    # random symmetric 0/1 adjacency, no self loops
    u = jax.random.uniform(k_a, (N, N))
    a = (u < 0.3)
    a = jnp.logical_or(a, a.T)
    a = jnp.logical_and(a, ~jnp.eye(N, dtype=bool))
    adj = a.astype(jnp.float32)

    params = init_params(k_p, F, HIDDEN, NCLS)
    pparams = pad_params(params)

    cls = forward(x, adj, pparams)
    jax.block_until_ready(cls)

    assert cls.shape == (1, NCLS)
    # log_softmax rows sum (in prob space) to 1
    assert jnp.allclose(jnp.sum(jnp.exp(cls), axis=-1), 1.0, atol=1e-4)

    # validate against pure-JAX f32 reference; tolerance covers the bf16
    # adjacency/message matmul (adj cast itself is exact, (d*xw) is not)
    ref = reference_forward(x, adj, params)
    assert jnp.allclose(cls, ref, atol=2e-2, rtol=2e-2), (cls, ref)

    print("KERNEL_OK")
</pallas_src>

<mosaic_0001>
module attributes {stable_mosaic.version = 11 : i64} {
  func.func @_fused_kernel(%arg0: memref<16x128xf32, #tpu.memory_space<vmem>>, %arg1: memref<16x16xbf16, #tpu.memory_space<vmem>>, %arg2: memref<128x128xf32, #tpu.memory_space<vmem>>, %arg3: memref<1x128xf32, #tpu.memory_space<vmem>>, %arg4: memref<128x128xf32, #tpu.memory_space<vmem>>, %arg5: memref<1x128xf32, #tpu.memory_space<vmem>>, %arg6: memref<128x1xf32, #tpu.memory_space<vmem>>, %arg7: memref<128x1xf32, #tpu.memory_space<vmem>>, %arg8: memref<512x128xf32, #tpu.memory_space<vmem>>, %arg9: memref<1x128xf32, #tpu.memory_space<vmem>>, %arg10: memref<1x128xf32, #tpu.memory_space<vmem>>) attributes {dimension_semantics = [], scalar_prefetch = 0 : i64, scratch_operands = 0 : i64, tpu.core_type = #tpu.core_type<tc>} {
    %c0 = arith.constant 0 : index
    %c0_0 = arith.constant 0 : index
    %0 = vector.load %arg0[%c0, %c0_0] : memref<16x128xf32, #tpu.memory_space<vmem>>, vector<16x128xf32>
    %c0_1 = arith.constant 0 : index
    %c0_2 = arith.constant 0 : index
    %1 = vector.load %arg1[%c0_1, %c0_2] : memref<16x16xbf16, #tpu.memory_space<vmem>>, vector<16x16xbf16>
    %c0_3 = arith.constant 0 : index
    %c0_4 = arith.constant 0 : index
    %2 = vector.load %arg2[%c0_3, %c0_4] : memref<128x128xf32, #tpu.memory_space<vmem>>, vector<128x128xf32>
    %c0_5 = arith.constant 0 : index
    %c0_6 = arith.constant 0 : index
    %3 = vector.load %arg3[%c0_5, %c0_6] : memref<1x128xf32, #tpu.memory_space<vmem>>, vector<1x128xf32>
    %cst = arith.constant dense<0.000000e+00> : vector<16x128xf32>
    %4 = tpu.matmul %0, %2, %cst {dimension_numbers = #tpu.dot_dimension_numbers<[1], [0], [0], [1], [0, 0, 1, 1], [], []>} : vector<16x128xf32>, vector<128x128xf32>, vector<16x128xf32> -> vector<16x128xf32>
    %cst_7 = arith.constant 1.000000e+00 : bf16
    %5 = vector.broadcast %cst_7 : bf16 to vector<16x1xbf16>
    %cst_8 = arith.constant dense<0.000000e+00> : vector<16x1xf32>
    %6 = tpu.matmul %1, %5, %cst_8 {dimension_numbers = #tpu.dot_dimension_numbers<[1], [0], [0], [1], [0, 0, 1, 1], [], []>} : vector<16x16xbf16>, vector<16x1xbf16>, vector<16x1xf32> -> vector<16x1xf32>
    %cst_9 = arith.constant 1.000000e+00 : f32
    %7 = vector.broadcast %cst_9 : f32 to vector<16x1xf32>
    %8 = arith.addf %6, %7 : vector<16x1xf32>
    %9 = math.rsqrt %8 : vector<16x1xf32>
    %10 = vector.broadcast %9 : vector<16x1xf32> to vector<16x128xf32>
    %11 = arith.mulf %10, %4 : vector<16x128xf32>
    %12 = arith.truncf %11 : vector<16x128xf32> to vector<16x128xbf16>
    %cst_10 = arith.constant dense<0.000000e+00> : vector<16x128xf32>
    %13 = tpu.matmul %1, %12, %cst_10 {dimension_numbers = #tpu.dot_dimension_numbers<[1], [0], [0], [1], [0, 0, 1, 1], [], []>} : vector<16x16xbf16>, vector<16x128xbf16>, vector<16x128xf32> -> vector<16x128xf32>
    %14 = vector.broadcast %9 : vector<16x1xf32> to vector<16x128xf32>
    %15 = arith.mulf %14, %13 : vector<16x128xf32>
    %16 = arith.mulf %9, %9 : vector<16x1xf32>
    %17 = vector.broadcast %16 : vector<16x1xf32> to vector<16x128xf32>
    %18 = arith.mulf %17, %4 : vector<16x128xf32>
    %19 = arith.addf %15, %18 : vector<16x128xf32>
    %20 = vector.broadcast %3 : vector<1x128xf32> to vector<16x128xf32>
    %21 = arith.addf %19, %20 : vector<16x128xf32>
    %c0_11 = arith.constant 0 : index
    %c0_12 = arith.constant 0 : index
    %22 = vector.load %arg6[%c0_11, %c0_12] : memref<128x1xf32, #tpu.memory_space<vmem>>, vector<128x1xf32>
    %cst_13 = arith.constant dense<0.000000e+00> : vector<16x1xf32>
    %23 = tpu.matmul %21, %22, %cst_13 {dimension_numbers = #tpu.dot_dimension_numbers<[1], [0], [0], [1], [0, 0, 1, 1], [], []>} : vector<16x128xf32>, vector<128x1xf32>, vector<16x1xf32> -> vector<16x1xf32>
    %24 = math.tanh %23 : vector<16x1xf32>
    %25 = tpu.iota {dimensions = array<i32: 0>} : vector<16x16xi32>
    %26 = tpu.iota {dimensions = array<i32: 1>} : vector<16x16xi32>
    %27 = arith.cmpi eq, %25, %26 : vector<16x16xi32>
    %cst_14 = arith.constant 0.000000e+00 : f32
    %28 = vector.shape_cast %24 : vector<16x1xf32> to vector<16x1xf32>
    %29 = vector.broadcast %28 : vector<16x1xf32> to vector<16x16xf32>
    %30 = vector.broadcast %cst_14 : f32 to vector<16x16xf32>
    %31 = arith.select %27, %29, %30 : vector<16x16xi1>, vector<16x16xf32>
    %cst_15 = arith.constant dense<0.000000e+00> : vector<16xf32>
    %32 = vector.multi_reduction <add>, %31, %cst_15 [0] : vector<16x16xf32> to vector<16xf32>
    %33 = vector.shape_cast %32 : vector<16xf32> to vector<1x16xf32>
    %34 = vector.broadcast %24 : vector<16x1xf32> to vector<16x16xf32>
    %35 = vector.broadcast %33 : vector<1x16xf32> to vector<16x16xf32>
    %36 = arith.cmpf ogt, %34, %35 : vector<16x16xf32>
    %37 = vector.broadcast %24 : vector<16x1xf32> to vector<16x16xf32>
    %38 = vector.broadcast %33 : vector<1x16xf32> to vector<16x16xf32>
    %39 = arith.cmpf oeq, %37, %38 : vector<16x16xf32>
    %40 = arith.cmpi slt, %25, %26 : vector<16x16xi32>
    %41 = arith.andi %39, %40 : vector<16x16xi1>
    %42 = arith.ori %36, %41 : vector<16x16xi1>
    %43 = arith.extui %42 : vector<16x16xi1> to vector<16x16xi32>
    %44 = arith.sitofp %43 : vector<16x16xi32> to vector<16x16xf32>
    %cst_16 = arith.constant dense<0.000000e+00> : vector<16xf32>
    %45 = vector.multi_reduction <add>, %44, %cst_16 [0] : vector<16x16xf32> to vector<16xf32>
    %46 = vector.shape_cast %45 : vector<16xf32> to vector<1x16xf32>
    %47 = tpu.iota {dimensions = array<i32: 0>} : vector<8x16xi32>
    %48 = arith.sitofp %47 : vector<8x16xi32> to vector<8x16xf32>
    %49 = vector.broadcast %46 : vector<1x16xf32> to vector<8x16xf32>
    %50 = arith.cmpf oeq, %48, %49 : vector<8x16xf32>
    %51 = arith.extui %50 : vector<8x16xi1> to vector<8x16xi32>
    %52 = arith.sitofp %51 : vector<8x16xi32> to vector<8x16xf32>
    %53 = vector.broadcast %33 : vector<1x16xf32> to vector<8x16xf32>
    %54 = arith.mulf %52, %53 : vector<8x16xf32>
    %cst_17 = arith.constant dense<0.000000e+00> : vector<8x128xf32>
    %55 = tpu.matmul %54, %21, %cst_17 {dimension_numbers = #tpu.dot_dimension_numbers<[1], [0], [0], [1], [0, 0, 1, 1], [], []>} : vector<8x16xf32>, vector<16x128xf32>, vector<8x128xf32> -> vector<8x128xf32>
    %56 = arith.truncf %52 : vector<8x16xf32> to vector<8x16xbf16>
    %cst_18 = arith.constant dense<0.000000e+00> : vector<8x16xf32>
    %57 = tpu.matmul %56, %1, %cst_18 {dimension_numbers = #tpu.dot_dimension_numbers<[1], [0], [0], [1], [0, 0, 1, 1], [], []>} : vector<8x16xbf16>, vector<16x16xbf16>, vector<8x16xf32> -> vector<8x16xf32>
    %58 = arith.truncf %57 : vector<8x16xf32> to vector<8x16xbf16>
    %cst_19 = arith.constant dense<0.000000e+00> : vector<8x8xf32>
    %59 = tpu.matmul %58, %56, %cst_19 {dimension_numbers = #tpu.dot_dimension_numbers<[1], [1], [0], [0], [0, 0, 1, 0], [], []>} : vector<8x16xbf16>, vector<8x16xbf16>, vector<8x8xf32> -> vector<8x8xf32>
    %c0_20 = arith.constant 0 : index
    %c0_21 = arith.constant 0 : index
    %60 = vector.load %arg4[%c0_20, %c0_21] : memref<128x128xf32, #tpu.memory_space<vmem>>, vector<128x128xf32>
    %c0_22 = arith.constant 0 : index
    %c0_23 = arith.constant 0 : index
    %61 = vector.load %arg5[%c0_22, %c0_23] : memref<1x128xf32, #tpu.memory_space<vmem>>, vector<1x128xf32>
    %cst_24 = arith.constant dense<0.000000e+00> : vector<8x128xf32>
    %62 = tpu.matmul %55, %60, %cst_24 {dimension_numbers = #tpu.dot_dimension_numbers<[1], [0], [0], [1], [0, 0, 1, 1], [], []>} : vector<8x128xf32>, vector<128x128xf32>, vector<8x128xf32> -> vector<8x128xf32>
    %63 = arith.truncf %59 : vector<8x8xf32> to vector<8x8xbf16>
    %cst_25 = arith.constant 1.000000e+00 : bf16
    %64 = vector.broadcast %cst_25 : bf16 to vector<8x1xbf16>
    %cst_26 = arith.constant dense<0.000000e+00> : vector<8x1xf32>
    %65 = tpu.matmul %63, %64, %cst_26 {dimension_numbers = #tpu.dot_dimension_numbers<[1], [0], [0], [1], [0, 0, 1, 1], [], []>} : vector<8x8xbf16>, vector<8x1xbf16>, vector<8x1xf32> -> vector<8x1xf32>
    %cst_27 = arith.constant 1.000000e+00 : f32
    %66 = vector.broadcast %cst_27 : f32 to vector<8x1xf32>
    %67 = arith.addf %65, %66 : vector<8x1xf32>
    %68 = math.rsqrt %67 : vector<8x1xf32>
    %69 = vector.broadcast %68 : vector<8x1xf32> to vector<8x128xf32>
    %70 = arith.mulf %69, %62 : vector<8x128xf32>
    %71 = arith.truncf %70 : vector<8x128xf32> to vector<8x128xbf16>
    %cst_28 = arith.constant dense<0.000000e+00> : vector<8x128xf32>
    %72 = tpu.matmul %63, %71, %cst_28 {dimension_numbers = #tpu.dot_dimension_numbers<[1], [0], [0], [1], [0, 0, 1, 1], [], []>} : vector<8x8xbf16>, vector<8x128xbf16>, vector<8x128xf32> -> vector<8x128xf32>
    %73 = vector.broadcast %68 : vector<8x1xf32> to vector<8x128xf32>
    %74 = arith.mulf %73, %72 : vector<8x128xf32>
    %75 = arith.mulf %68, %68 : vector<8x1xf32>
    %76 = vector.broadcast %75 : vector<8x1xf32> to vector<8x128xf32>
    %77 = arith.mulf %76, %62 : vector<8x128xf32>
    %78 = arith.addf %74, %77 : vector<8x128xf32>
    %79 = vector.broadcast %61 : vector<1x128xf32> to vector<8x128xf32>
    %80 = arith.addf %78, %79 : vector<8x128xf32>
    %cst_29 = arith.constant dense<0xFF800000> : vector<128xf32>
    %81 = vector.multi_reduction <maximumf>, %55, %cst_29 [0] : vector<8x128xf32> to vector<128xf32>
    %82 = vector.shape_cast %81 : vector<128xf32> to vector<1x128xf32>
    %cst_30 = arith.constant dense<0.000000e+00> : vector<128xf32>
    %83 = vector.multi_reduction <add>, %55, %cst_30 [0] : vector<8x128xf32> to vector<128xf32>
    %84 = vector.shape_cast %83 : vector<128xf32> to vector<1x128xf32>
    %cst_31 = arith.constant 8.000000e+00 : f32
    %85 = vector.broadcast %cst_31 : f32 to vector<1x128xf32>
    %86 = arith.divf %84, %85 : vector<1x128xf32>
    %c0_32 = arith.constant 0 : index
    %c0_33 = arith.constant 0 : index
    %87 = vector.load %arg7[%c0_32, %c0_33] : memref<128x1xf32, #tpu.memory_space<vmem>>, vector<128x1xf32>
    %cst_34 = arith.constant dense<0.000000e+00> : vector<8x1xf32>
    %88 = tpu.matmul %80, %87, %cst_34 {dimension_numbers = #tpu.dot_dimension_numbers<[1], [0], [0], [1], [0, 0, 1, 1], [], []>} : vector<8x128xf32>, vector<128x1xf32>, vector<8x1xf32> -> vector<8x1xf32>
    %89 = math.tanh %88 : vector<8x1xf32>
    %90 = tpu.iota {dimensions = array<i32: 0>} : vector<8x8xi32>
    %91 = tpu.iota {dimensions = array<i32: 1>} : vector<8x8xi32>
    %92 = arith.cmpi eq, %90, %91 : vector<8x8xi32>
    %cst_35 = arith.constant 0.000000e+00 : f32
    %93 = vector.shape_cast %89 : vector<8x1xf32> to vector<8x1xf32>
    %94 = vector.broadcast %93 : vector<8x1xf32> to vector<8x8xf32>
    %95 = vector.broadcast %cst_35 : f32 to vector<8x8xf32>
    %96 = arith.select %92, %94, %95 : vector<8x8xi1>, vector<8x8xf32>
    %cst_36 = arith.constant dense<0.000000e+00> : vector<8xf32>
    %97 = vector.multi_reduction <add>, %96, %cst_36 [0] : vector<8x8xf32> to vector<8xf32>
    %98 = vector.shape_cast %97 : vector<8xf32> to vector<1x8xf32>
    %99 = vector.broadcast %89 : vector<8x1xf32> to vector<8x8xf32>
    %100 = vector.broadcast %98 : vector<1x8xf32> to vector<8x8xf32>
    %101 = arith.cmpf ogt, %99, %100 : vector<8x8xf32>
    %102 = vector.broadcast %89 : vector<8x1xf32> to vector<8x8xf32>
    %103 = vector.broadcast %98 : vector<1x8xf32> to vector<8x8xf32>
    %104 = arith.cmpf oeq, %102, %103 : vector<8x8xf32>
    %105 = arith.cmpi slt, %90, %91 : vector<8x8xi32>
    %106 = arith.andi %104, %105 : vector<8x8xi1>
    %107 = arith.ori %101, %106 : vector<8x8xi1>
    %108 = arith.extui %107 : vector<8x8xi1> to vector<8x8xi32>
    %109 = arith.sitofp %108 : vector<8x8xi32> to vector<8x8xf32>
    %cst_37 = arith.constant dense<0.000000e+00> : vector<8xf32>
    %110 = vector.multi_reduction <add>, %109, %cst_37 [0] : vector<8x8xf32> to vector<8xf32>
    %111 = vector.shape_cast %110 : vector<8xf32> to vector<1x8xf32>
    %112 = tpu.iota {dimensions = array<i32: 0>} : vector<4x8xi32>
    %113 = arith.sitofp %112 : vector<4x8xi32> to vector<4x8xf32>
    %114 = vector.broadcast %111 : vector<1x8xf32> to vector<4x8xf32>
    %115 = arith.cmpf oeq, %113, %114 : vector<4x8xf32>
    %116 = arith.extui %115 : vector<4x8xi1> to vector<4x8xi32>
    %117 = arith.sitofp %116 : vector<4x8xi32> to vector<4x8xf32>
    %118 = vector.broadcast %98 : vector<1x8xf32> to vector<4x8xf32>
    %119 = arith.mulf %117, %118 : vector<4x8xf32>
    %cst_38 = arith.constant dense<0.000000e+00> : vector<4x128xf32>
    %120 = tpu.matmul %119, %80, %cst_38 {dimension_numbers = #tpu.dot_dimension_numbers<[1], [0], [0], [1], [0, 0, 1, 1], [], []>} : vector<4x8xf32>, vector<8x128xf32>, vector<4x128xf32> -> vector<4x128xf32>
    %cst_39 = arith.constant dense<0xFF800000> : vector<128xf32>
    %121 = vector.multi_reduction <maximumf>, %120, %cst_39 [0] : vector<4x128xf32> to vector<128xf32>
    %122 = vector.shape_cast %121 : vector<128xf32> to vector<1x128xf32>
    %cst_40 = arith.constant dense<0.000000e+00> : vector<128xf32>
    %123 = vector.multi_reduction <add>, %120, %cst_40 [0] : vector<4x128xf32> to vector<128xf32>
    %124 = vector.shape_cast %123 : vector<128xf32> to vector<1x128xf32>
    %cst_41 = arith.constant 4.000000e+00 : f32
    %125 = vector.broadcast %cst_41 : f32 to vector<1x128xf32>
    %126 = arith.divf %124, %125 : vector<1x128xf32>
    %127 = tpu.concatenate %82, %86, %122, %126 in 1 : vector<1x128xf32>, vector<1x128xf32>, vector<1x128xf32>, vector<1x128xf32> -> vector<1x512xf32>
    %c0_42 = arith.constant 0 : index
    %c0_43 = arith.constant 0 : index
    %128 = vector.load %arg8[%c0_42, %c0_43] : memref<512x128xf32, #tpu.memory_space<vmem>>, vector<512x128xf32>
    %cst_44 = arith.constant dense<0.000000e+00> : vector<1x128xf32>
    %129 = tpu.matmul %127, %128, %cst_44 {dimension_numbers = #tpu.dot_dimension_numbers<[1], [0], [0], [1], [0, 0, 1, 1], [], []>} : vector<1x512xf32>, vector<512x128xf32>, vector<1x128xf32> -> vector<1x128xf32>
    %c0_45 = arith.constant 0 : index
    %c0_46 = arith.constant 0 : index
    %130 = vector.load %arg9[%c0_45, %c0_46] : memref<1x128xf32, #tpu.memory_space<vmem>>, vector<1x128xf32>
    %131 = arith.addf %129, %130 : vector<1x128xf32>
    %132 = tpu.iota {dimensions = array<i32: 1>} : vector<1x128xi32>
    %c4_i32 = arith.constant 4 : i32
    %133 = vector.broadcast %c4_i32 : i32 to vector<1x128xi32>
    %134 = arith.cmpi slt, %132, %133 : vector<1x128xi32>
    %cst_47 = arith.constant -1.000000e+30 : f32
    %135 = vector.broadcast %cst_47 : f32 to vector<1x128xf32>
    %136 = arith.select %134, %131, %135 : vector<1x128xi1>, vector<1x128xf32>
    %cst_48 = arith.constant dense<0xFF800000> : vector<1xf32>
    %137 = vector.multi_reduction <maximumf>, %136, %cst_48 [1] : vector<1x128xf32> to vector<1xf32>
    %138 = vector.shape_cast %137 : vector<1xf32> to vector<1x1xf32>
    %139 = vector.broadcast %138 : vector<1x1xf32> to vector<1x128xf32>
    %140 = arith.subf %136, %139 : vector<1x128xf32>
    %141 = math.exp %140 : vector<1x128xf32>
    %cst_49 = arith.constant dense<0.000000e+00> : vector<1xf32>
    %142 = vector.multi_reduction <add>, %141, %cst_49 [1] : vector<1x128xf32> to vector<1xf32>
    %143 = vector.shape_cast %142 : vector<1xf32> to vector<1x1xf32>
    %144 = math.log %143 : vector<1x1xf32>
    %145 = vector.broadcast %144 : vector<1x1xf32> to vector<1x128xf32>
    %146 = arith.subf %140, %145 : vector<1x128xf32>
    %c0_50 = arith.constant 0 : index
    %c0_51 = arith.constant 0 : index
    %147 = vector.load %arg10[%c0_50, %c0_51] : memref<1x128xf32, #tpu.memory_space<vmem>>, vector<1x128xf32>
    tpu.vector_store %arg10[%c0_50, %c0_51], %146 {strides = array<i32>} : memref<1x128xf32, #tpu.memory_space<vmem>>, vector<1x128xf32>,
    return
  }
}

</mosaic_0001>

<bundles_post_ra>
// kernel: tpu_custom_call.1
= control target key start
LH: loop header
LB: loop body
LE: loop exit
PB: predicated region body
PF: predicated region fallthrough
CT: control target
= control target key end

     0   :  { %15 = vsyncpa [#allocation3], 0  ;;  %s2372_s0 = inlined_call_operand.hbm [shape: f32[16,128], index: 0, kind: input, shape index: {}]   ;;  %s2373_s1 = inlined_call_operand.hbm [shape: bf16[16,16], index: 1, kind: input, shape index: {}]   ;;  %s2374_s2 = inlined_call_operand.vmem [shape: f32[128,128], index: 2, kind: input, shape index: {}]   ;;  %s2375_s3 = inlined_call_operand.vmem [shape: f32[1,128], index: 3, kind: input, shape index: {}]   ;;  %s2376_s4 = inlined_call_operand.vmem [shape: f32[128,128], index: 4, kind: input, shape index: {}]   ;;  %s2377_s5 = inlined_call_operand.vmem [shape: f32[1,128], index: 5, kind: input, shape index: {}]   ;;  %s2378_s6 = inlined_call_operand.vmem [shape: f32[128,1], index: 6, kind: input, shape index: {}]   ;;  %s2379_s7 = inlined_call_operand.vmem [shape: f32[128,1], index: 7, kind: input, shape index: {}]   ;;  %s2380_s8 = inlined_call_operand.hbm [shape: f32[512,128], index: 8, kind: input, shape index: {}]   ;;  %s2381_s9 = inlined_call_operand.vmem [shape: f32[1,128], index: 9, kind: input, shape index: {}]   ;;  %s2382_s10 = inlined_call_operand.hbm [shape: f32[1,128], index: 10, kind: output, shape index: {}]  }
   0x1   :  { %16 = vsyncpa [#allocation6], 0 }
   0x2   :  { %17 = vsyncpa [#allocation4], 0  ;;  %s1944_s13 = smov [#allocation5]   ;;  %s1850_s17 = scalar_lea.hbm %s2373_s1, 128 }
   0x3   :  { %s35_s14 = sshll.u32 %s1944_s13, 4  ;;  %p1851_p0 = scmp.ne.s32.totalorder %s2373_s1, %s1850_s17  ;;  %s36_s14 = int_to_ptr.vmem [resolvable:$true] %s35_s14 }
   0x4   :  { %p1854_p1 = scmp.lt.u32.totalorder %s1850_s17, %s2373_s1 }
   0x6   :  { %p1856_p2 = pnand %p1854_p1, %p1851_p0 }
   0x8   :  { %1859 = shalt.err (!%p1856_p2)
}
   0x9   :  { %s1860_s22 = scalar_lea.vmem %s36_s14, 128  ;;  %p1865_p4 = scmp.lt.s32.totalorder %s36_s14, %s36_s14 }
   0xa   :  { %p1861_p3 = scmp.ne.s32.totalorder %s36_s14, %s1860_s22  ;;  %p1866_p5 = scmp.lt.s32.totalorder %s1860_s22, %s1860_s22 }
   0xc   :  { %p1867_p6 = por %p1866_p5, %p1865_p4 }
   0xe   :  { %p1868_p7 = pnand %p1867_p6, %p1861_p3 }
  0x10   :  { %1871 = shalt.err (!%p1868_p7)
}
  0x11   :  { %s1945_s23 = smov 64   ;;  %s1946_s24 = smov 4  }
  0x12   :  { %41 = dma.hbm_to_vmem [thread:$0]  %s2373_s1, 128, %s36_s14, [#allocation6], %s1945_s23, %s1945_s23, %s1946_s24  }
  0x13   :  { %s1947_s27 = smov [#allocation2]   ;;  %s1872_s11 = scalar_lea.hbm %s2372_s0, 256 }
  0x14   :  { %s23_s28 = sshll.u32 %s1947_s27, 4  ;;  %p1873_p8 = scmp.ne.s32.totalorder %s2372_s0, %s1872_s11  ;;  %s24_s28 = int_to_ptr.vmem [resolvable:$true] %s23_s28 }
  0x15   :  { %p1876_p9 = scmp.lt.u32.totalorder %s1872_s11, %s2372_s0 }
  0x17   :  { %p1878_p10 = pnand %p1876_p9, %p1873_p8 }
  0x19   :  { %1881 = shalt.err (!%p1878_p10)
}
  0x1a   :  { %s1882_s17 = scalar_lea.vmem %s24_s28, 256  ;;  %p1887_p12 = scmp.lt.s32.totalorder %s24_s28, %s24_s28 }
  0x1b   :  { %p1883_p11 = scmp.ne.s32.totalorder %s24_s28, %s1882_s17  ;;  %p1888_p13 = scmp.lt.s32.totalorder %s1882_s17, %s1882_s17 }
  0x1d   :  { %p1889_p0 = por %p1888_p13, %p1887_p12 }
  0x1f   :  { %p1890_p1 = pnand %p1889_p0, %p1883_p11 }
  0x21   :  { %1893 = shalt.err (!%p1890_p1)
}
  0x22   :  { %s1948_s1 = smov 128   ;;  %s1949_s14 = smov 8  }
  0x23   :  { %29 = dma.hbm_to_vmem [thread:$0]  %s2372_s0, 256, %s24_s28, [#allocation3], %s1948_s1, %s1948_s1, %s1949_s14  }
  0x24   :  { %s1950_s20 = smov [#allocation7]   ;;  %s1894_s24 = scalar_lea.hbm %s2380_s8, 8192 }
  0x25   :  { %s59_s21 = sshll.u32 %s1950_s20, 4  ;;  %p1895_p2 = scmp.ne.s32.totalorder %s2380_s8, %s1894_s24  ;;  %s60_s21 = int_to_ptr.vmem [resolvable:$true] %s59_s21 }
  0x26   :  { %p1898_p3 = scmp.lt.u32.totalorder %s1894_s24, %s2380_s8 }
  0x28   :  { %p1900_p4 = pnand %p1898_p3, %p1895_p2 }
  0x2a   :  { %1903 = shalt.err (!%p1900_p4)
}
  0x2b   :  { %s1904_s30 = scalar_lea.vmem %s60_s21, 8192  ;;  %p1909_p6 = scmp.lt.s32.totalorder %s60_s21, %s60_s21 }
  0x2c   :  { %p1905_p5 = scmp.ne.s32.totalorder %s60_s21, %s1904_s30  ;;  %p1910_p7 = scmp.lt.s32.totalorder %s1904_s30, %s1904_s30 }
  0x2e   :  { %p1911_p8 = por %p1910_p7, %p1909_p6 }
  0x30   :  { %p1912_p9 = pnand %p1911_p8, %p1905_p5 }
  0x32   :  { %1915 = shalt.err (!%p1912_p9)
}
  0x33   :  { %65 = dma.hbm_to_vmem [thread:$0]  %s2380_s8, 8192, %s60_s21, [#allocation6], %s1948_s1, %s1948_s1, %s1949_s14  }
  0x34   :  { %1938 = dma.done.wait [#allocation3], 256  }
  0x35   :  { %1939 = vsyncadd [#allocation3], 4294967040 }
  0x36   :  { %1940 = dma.done.wait [#allocation6], 8320  }
  0x37   :  { %1941 = vsyncadd [#allocation6], 4294958976  ;;  %v1951_v0 = vmov 0.0   ;;  %vm1952_vm0 = vmmov 0   ;;  %v1953_v1 = vmov 1065369472  }
  0x38   :  { %1486 = vmatprep.subr.bf16.mxu1 %v1951_v0  ;;  %1488 = vmatprep.mubr.msk.bf16.mxu1 %vm1952_vm0, %v1951_v0  ;;  %vm180_vm1 = vcmask 130048   ;;  %v2052_v2 = vld [vmem:[#allocation5] sm:$0xff]   ;;  %v83_v3 = vld [vmem:[%s2374_s2] sm:$0xff]  ;;  %v84_v4 = vld [vmem:[%s2374_s2 + $0x8] sm:$0xff]  ;;  %v1954_v29 = vmov 0   ;;  %vm710_vm15 = vcmask 1043456  }
  0x39   :  { %1487 = vmatpush3.bf16.msra.mxu1 %v1953_v1  ;;  %v85_v5 = vld [vmem:[%s2374_s2 + $0x10] sm:$0xff]  ;;  %v1639_v6 = vpack.c.bf16 %v84_v4, %v83_v3  ;;  %v86_v7 = vld [vmem:[%s2374_s2 + $0x18] sm:$0xff]  ;;  %v87_v9 = vld [vmem:[%s2374_s2 + $0x20] sm:$0xff]  ;;  %1831 = vset.pattern.permute.xlu0 %v1954_v29 }
  0x3a   :  { %1492 = vmatprep.subr.bf16.mxu1 %v1951_v0  ;;  %v1643_v8 = vpack.c.bf16 %v86_v7, %v85_v5  ;;  %v88_v10 = vld [vmem:[%s2374_s2 + $0x28] sm:$0xff]  ;;  %v79_v12 = vld [vmem:[#allocation2] sm:$0xff]  ;;  %v89_v13 = vld [vmem:[%s2374_s2 + $0x30] sm:$0xff]  ;;  %1832 = vset.pattern.permute.xlu1 %v1954_v29 }
  0x3b   :  { %1640 = vmatprep.subr.bf16.mxu0 %v1639_v6  ;;  %v1647_v11 = vpack.c.bf16 %v88_v10, %v87_v9  ;;  %v90_v14 = vld [vmem:[%s2374_s2 + $0x38] sm:$0xff]  ;;  %1483 = vmatprep.mubr.f32.mxu0 %v79_v12  ;;  %v91_v16 = vld [vmem:[%s2374_s2 + $0x40] sm:$0xff]  ;;  %v92_v17 = vld [vmem:[%s2374_s2 + $0x48] sm:$0xff]  ;;  %v1955_v9 = vmov 0.0|0.0  }
  0x3c   :  { %1489 = vmatmul.mubr.msk.bf16.vlgmr.msra.gmra.mrb[0].mxu1 %vm180_vm1, %v2052_v2  ;;  %1642 = vmatpush3.bf16.msra.mxu0 %v1639_v6  ;;  %v1651_v15 = vpack.c.bf16 %v90_v14, %v89_v13  ;;  %v1655_v18 = vpack.c.bf16 %v92_v17, %v91_v16  ;;  %v93_v19 = vld [vmem:[%s2374_s2 + $0x50] sm:$0xff]  ;;  %v94_v20 = vld [vmem:[%s2374_s2 + $0x58] sm:$0xff]  ;;  %v95_v22 = vld [vmem:[%s2374_s2 + $0x60] sm:$0xff] }
  0x3d   :  { %1494 = vmatprep.mubr.msk.bf16.mxu1 %vm1952_vm0, %v1951_v0  ;;  %1644 = vmatprep.subr.bf16.mxu0 %v1643_v8  ;;  %v1659_v21 = vpack.c.bf16 %v94_v20, %v93_v19  ;;  %v96_v23 = vld [vmem:[%s2374_s2 + $0x68] sm:$0xff]  ;;  %v97_v25 = vld [vmem:[%s2374_s2 + $0x70] sm:$0xff]  ;;  %v98_v26 = vld [vmem:[%s2374_s2 + $0x78] sm:$0xff] }
  0x3e   :  { %v1663_v24 = vpack.c.bf16 %v96_v23, %v95_v22  ;;  %v1667_v27 = vpack.c.bf16 %v98_v26, %v97_v25  ;;  %v80_v28 = vld [vmem:[#allocation2 + $0x8] sm:$0xff]  ;;  %v307_v43 = vld [vmem:[%s2378_s6] sm:$0xff]  ;;  %v309_v50 = vld [vmem:[%s2378_s6 + $0x10] sm:$0xff] }
  0x3f   :  { %v308_v44 = vld [vmem:[%s2378_s6 + $0x8] sm:$0xff]  ;;  %v310_v51 = vld [vmem:[%s2378_s6 + $0x18] sm:$0xff]  ;;  %v311_v53 = vld [vmem:[%s2378_s6 + $0x20] sm:$0xff] }
  0x40   :  { %1646 = vmatpush3.bf16.msra.mxu0 %v1643_v8  ;;  %v1671_v48 = vpack.c.bf16 %v308_v44, %v307_v43  ;;  %v1675_v52 = vpack.c.bf16 %v310_v51, %v309_v50  ;;  %v312_v54 = vld [vmem:[%s2378_s6 + $0x28] sm:$0xff]  ;;  %v313_v56 = vld [vmem:[%s2378_s6 + $0x30] sm:$0xff]  ;;  %v314_v57 = vld [vmem:[%s2378_s6 + $0x38] sm:$0xff] }
  0x41   :  { %1648 = vmatprep.subr.bf16.mxu0 %v1647_v11  ;;  %v1679_v55 = vpack.c.bf16 %v312_v54, %v311_v53  ;;  %v1683_v58 = vpack.c.bf16 %v314_v57, %v313_v56  ;;  %v315_v59 = vld [vmem:[%s2378_s6 + $0x40] sm:$0xff]  ;;  %v316_v60 = vld [vmem:[%s2378_s6 + $0x48] sm:$0xff]  ;;  %v317_v62 = vld [vmem:[%s2378_s6 + $0x50] sm:$0xff] }
  0x42   :  { %v1687_v61 = vpack.c.bf16 %v316_v60, %v315_v59  ;;  %v318_v63 = vld [vmem:[%s2378_s6 + $0x58] sm:$0xff]  ;;  %v319_v3 = vld [vmem:[%s2378_s6 + $0x60] sm:$0xff]  ;;  %v320_v4 = vld [vmem:[%s2378_s6 + $0x68] sm:$0xff] }
  0x43   :  { %v1691_v1 = vpack.c.bf16 %v318_v63, %v317_v62  ;;  %v1695_v5 = vpack.c.bf16 %v320_v4, %v319_v3  ;;  %v321_v6 = vld [vmem:[%s2378_s6 + $0x70] sm:$0xff]  ;;  %v322_v7 = vld [vmem:[%s2378_s6 + $0x78] sm:$0xff]  ;;  %v1281_v16 = vld [vmem:[%s2375_s3] ss:$0 sm:$0xff] }
  0x44   :  { %1650 = vmatpush3.bf16.msra.mxu0 %v1647_v11  ;;  %v1699_v8 = vpack.c.bf16 %v322_v7, %v321_v6  ;;  %v619_v4 = vld [vmem:[%s2376_s4 + $0x8] sm:$0xff] }
  0x45   :  { %1652 = vmatprep.subr.bf16.mxu0 %v1651_v15 }
  0x48   :  { %1654 = vmatpush3.bf16.msra.mxu0 %v1651_v15 }
  0x49   :  { %1656 = vmatprep.subr.bf16.mxu0 %v1655_v18 }
  0x4c   :  { %1658 = vmatpush3.bf16.msra.mxu0 %v1655_v18 }
  0x4d   :  { %1660 = vmatprep.subr.bf16.mxu0 %v1659_v21 }
  0x50   :  { %1662 = vmatpush3.bf16.msra.mxu0 %v1659_v21 }
  0x51   :  { %1664 = vmatprep.subr.bf16.mxu0 %v1663_v24 }
  0x54   :  { %1666 = vmatpush3.bf16.msra.mxu0 %v1663_v24 }
  0x55   :  { %1668 = vmatprep.subr.bf16.mxu0 %v1667_v27 }
  0x58   :  { %1670 = vmatpush3.bf16.msra.mxu0 %v1667_v27 }
  0x59   :  { %1703 = vmatprep.subr.bf16.mxu0 %v1955_v9 }
  0x5b   :  { %1484 = vmatmul.mubr.f32.vlgmr.msra.gmra.mrb[0].mxu0 %v80_v28 }
  0x5c   :  { %1537 = vmatprep.mubr.msk.f32.mxu0 %vm1952_vm0, %v1951_v0 }
 0x10f   :  { %v218_v30 = vpop.f32.mrb[0].mxu1 }
 0x110   :  { %v219_v31 = vadd.f32 1.0, %v218_v30  ;;  %v1490_v32 = vpop.f32.mrb[1].mxu1 }
 0x111   :  { %v221_v33 = vpop.f32.mrb[2].mxu1 }
 0x112   :  { %1834 = vrsqrt.f32 %v219_v31  ;;  %v222_v34 = vadd.f32 1.0, %v221_v33  ;;  %v1491_v35 = vpop.f32.mrb[3].mxu1  ;;  %v400_v31 = vlaneseq }
 0x114   :  { %1836 = vrsqrt.f32 %v222_v34  ;;  %v2168_v32 = vshrl.u32 %v400_v31, 7  ;;  %v2171_v34 = vand.u32 127, %v400_v31  ;;  %v632_v31 = vld [vmem:[%s2376_s4 + $0x70] sm:$0xff] }
 0x116   :  { %v402_v33 = vadd.s32 8, %v2168_v32  ;;  %vm405_vm3 = vcmp.eq.s32.totalorder %v2168_v32, %v2171_v34  ;;  %vm432_vm4 = vcmp.lt.s32.totalorder %v2168_v32, %v2171_v34 }
 0x118   :  { %vm406_vm2 = vcmp.eq.s32.totalorder %v402_v33, %v2171_v34  ;;  %vm433_vm5 = vcmp.lt.s32.totalorder %v402_v33, %v2171_v34  ;;  %v633_v33 = vld [vmem:[%s2376_s4 + $0x78] sm:$0xff] }
 0x11c   :  { %v1835_v36 = vpop.eup %1834 }
 0x11d   :  { %229 = vperm.xlu0 %1831, %v1835_v36   ;;  %v283_v37 = vmul.f32 %v1835_v36, %v1835_v36 }
 0x11e   :  { %v1837_v38 = vpop.eup %1836 }
 0x11f   :  { %287 = vperm.xlu1 %1832, %v283_v37   ;;  %v284_v39 = vmul.f32 %v1837_v38, %v1837_v38 }
 0x121   :  { %234 = vperm.xlu0 %1831, %v1837_v38  }
 0x123   :  { %292 = vperm.xlu1 %1832, %v284_v39  }
 0x12e   :  { %v1485_v40 = vpop.f32.mrb[0].mxu0 }
 0x12f   :  { %v166_v41 = vpop.f32.mrb[1].mxu0 }
 0x19c   :  { %v230_v42 = vpop.permute.xlu0 %229 }
 0x19d   :  { %v237_v46 = vmul.f32 %v230_v42, %v166_v41 }
 0x19e   :  { %v288_v10 = vpop.permute.xlu1 %287 }
 0x19f   :  { %v295_v13 = vmul.f32 %v288_v10, %v166_v41  ;;  %v620_v10 = vld [vmem:[%s2376_s4 + $0x10] sm:$0xff] }
 0x1a0   :  { %v235_v45 = vpop.permute.xlu0 %234 }
 0x1a1   :  { %v238_v47 = vmul.f32 %v1485_v40, %v235_v45 }
 0x1a2   :  { %v293_v11 = vpop.permute.xlu1 %292 }
 0x1a3   :  { %v239_v49 = vpack.c.bf16 %v238_v47, %v237_v46  ;;  %v296_v18 = vmul.f32 %v1485_v40, %v293_v11  ;;  %v621_v11 = vld [vmem:[%s2376_s4 + $0x18] sm:$0xff] }
 0x1a5   :  { %1493 = vmatpush3.bf16.msra.mxu1 %v239_v49 }
 0x1a6   :  { %1672 = vmatprep.subr.bf16.mxu1 %v1671_v48 }
 0x1a8   :  { %1495 = vmatmul.mubr.msk.bf16.vlgmr.msra.gmra.mrb[4].mxu1 %vm180_vm1, %v2052_v2 }
 0x1a9   :  { %1674 = vmatpush3.bf16.msra.mxu1 %v1671_v48 }
 0x1aa   :  { %1676 = vmatprep.subr.bf16.mxu1 %v1675_v52 }
 0x1ad   :  { %1678 = vmatpush3.bf16.msra.mxu1 %v1675_v52 }
 0x1ae   :  { %1680 = vmatprep.subr.bf16.mxu1 %v1679_v55 }
 0x1b1   :  { %1682 = vmatpush3.bf16.msra.mxu1 %v1679_v55 }
 0x1b2   :  { %1684 = vmatprep.subr.bf16.mxu1 %v1683_v58 }
 0x1b5   :  { %1686 = vmatpush3.bf16.msra.mxu1 %v1683_v58  ;;  %v451_v58 = vcvt.s32.f32 %v2168_v32  ;;  %v1046_v32 = vld [vmem:[#allocation7 + $0x28] sm:$0xff] }
 0x1b6   :  { %1688 = vmatprep.subr.bf16.mxu1 %v1687_v61 }
 0x1b9   :  { %1690 = vmatpush3.bf16.msra.mxu1 %v1687_v61 }
 0x1ba   :  { %1692 = vmatprep.subr.bf16.mxu1 %v1691_v1 }
 0x1bd   :  { %1694 = vmatpush3.bf16.msra.mxu1 %v1691_v1 }
 0x1be   :  { %1696 = vmatprep.subr.bf16.mxu1 %v1695_v5 }
 0x1c1   :  { %1698 = vmatpush3.bf16.msra.mxu1 %v1695_v5 }
 0x1c2   :  { %1700 = vmatprep.subr.bf16.mxu1 %v1699_v8 }
 0x1c5   :  { %1702 = vmatpush3.bf16.msra.mxu1 %v1699_v8 }
 0x1c6   :  { %1546 = vmatprep.subr.bf16.mxu1 %v1951_v0 }
 0x27b   :  { %v274_v12 = vpop.f32.mrb[4].mxu1 }
 0x27c   :  { %v281_v14 = vmul.f32 %v274_v12, %v230_v42  ;;  %v1496_v15 = vpop.f32.mrb[5].mxu1 }
 0x27d   :  { %v277_v17 = vpop.f32.mrb[6].mxu1  ;;  %v622_v15 = vld [vmem:[%s2376_s4 + $0x20] sm:$0xff] }
 0x27e   :  { %v297_v19 = vadd.f32 %v295_v13, %v281_v14  ;;  %v282_v20 = vmul.f32 %v277_v17, %v235_v45  ;;  %v1497_v21 = vpop.f32.mrb[7].mxu1  ;;  %v1710_v14 = vpack.c.bf16 %v621_v11, %v620_v10  ;;  %v846_v10 = vld [vmem:[%s2379_s7 + $0x58] sm:$0xff] }
 0x27f   :  { %v626_v21 = vld [vmem:[%s2376_s4 + $0x40] sm:$0xff] }
 0x280   :  { %v298_v22 = vadd.f32 %v296_v18, %v282_v20  ;;  %v305_v23 = vadd.f32 %v1281_v16, %v297_v19  ;;  %v624_v18 = vld [vmem:[%s2376_s4 + $0x30] sm:$0xff]  ;;  %v625_v19 = vld [vmem:[%s2376_s4 + $0x38] sm:$0xff] }
 0x281   :  { %v1716_v20 = vpack.c.bf16 %v625_v19, %v624_v18 }
 0x282   :  { %v306_v24 = vadd.f32 %v1281_v16, %v298_v22  ;;  %1530 = vmatprep.mubr.f32.mxu1 %v305_v23  ;;  %v623_v16 = vld [vmem:[%s2376_s4 + $0x28] sm:$0xff] }
 0x283   :  { %v1713_v17 = vpack.c.bf16 %v623_v16, %v622_v15  ;;  %v627_v22 = vld [vmem:[%s2376_s4 + $0x48] sm:$0xff]  ;;  %v849_v15 = vld [vmem:[%s2379_s7 + $0x70] sm:$0xff]  ;;  %v850_v16 = vld [vmem:[%s2379_s7 + $0x78] sm:$0xff] }
 0x284   :  { %v1704_v25 = vpack.c.bf16 %v306_v24, %v305_v23  ;;  %1531 = vmatmul.mubr.f32.vlgmr.msra.gmra.mrb[8].mxu1 %v306_v24  ;;  %v1719_v23 = vpack.c.bf16 %v627_v22, %v626_v21  ;;  %v628_v24 = vld [vmem:[%s2376_s4 + $0x50] sm:$0xff] }
 0x285   :  { %1548 = vmatprep.mubr.msk.bf16.mxu1 %vm1952_vm0, %v1951_v0 }
 0x286   :  { %1705 = vmatpush3.bf16.msra.mxu0 %v1704_v25  ;;  %v629_v25 = vld [vmem:[%s2376_s4 + $0x58] sm:$0xff] }
 0x287   :  { %1540 = vmatprep.subr.bf16.mxu0 %v1951_v0 }
 0x357   :  { %v1532_v26 = vpop.f32.mrb[8].mxu1 }
 0x358   :  { %1838 = vtanh.f32 %v1532_v26  ;;  %v389_v27 = vpop.f32.mrb[9].mxu1  ;;  %v1722_v26 = vpack.c.bf16 %v629_v25, %v628_v24 }
 0x359   :  { %1840 = vtanh.f32 %v389_v27  ;;  %v630_v27 = vld [vmem:[%s2376_s4 + $0x60] sm:$0xff] }
 0x362   :  { %v1839_v28 = vpop.eup %1838 }
 0x363   :  { %v1841_v30 = vpop.eup %1840  ;;  %414 = vperm.xlu1 %1832, %v1839_v28   ;;  %v631_v28 = vld [vmem:[%s2376_s4 + $0x68] sm:$0xff] }
 0x364   :  { %409 = vperm.xlu0 %1831, %v1841_v30   ;;  %v1725_v30 = vpack.c.bf16 %v631_v28, %v630_v27 }
 0x3e2   :  { %v415_v35 = vpop.permute.xlu1 %414 }
 0x3e3   :  { %v418_v36 = vsel %vm406_vm2, %v415_v35, 0.0  ;;  %v410_v37 = vpop.permute.xlu0 %409 }
 0x3e4   :  { %v420_v38 = vsel %vm180_vm1, %v418_v36, 0.0  ;;  %v417_v39 = vsel %vm405_vm3, %v410_v37, 0.0  ;;  %v712_v36 = vsel %vm710_vm15, 1065369472, %v1954_v29 }
 0x3e5   :  { %v419_v40 = vsel %vm180_vm1, %v417_v39, 0.0 }
 0x3e6   :  { %v421_v41 = vadd.f32 %v420_v38, %v419_v40 }
 0x3e8   :  { %v422_v42 = vrot.slane %v421_v41, 4 }
 0x3ea   :  { %v423_v43 = vadd.f32 %v422_v42, %v421_v41 }
 0x3ec   :  { %v424_v44 = vrot.slane %v423_v43, 2 }
 0x3ee   :  { %v425_v45 = vadd.f32 %v424_v44, %v423_v43 }
 0x3f0   :  { %v426_v46 = vrot.slane %v425_v45, 1 }
 0x3f2   :  { %v427_v47 = vadd.f32 %v426_v46, %v425_v45 }
 0x3f4   :  { %vm428_vm6 = vcmp.gt.f32.partialorder %v410_v37, %v427_v47  ;;  %vm430_vm7 = vcmp.eq.f32.partialorder %v410_v37, %v427_v47  ;;  %vm431_vm8 = vcmp.eq.f32.partialorder %v415_v35, %v427_v47  ;;  %vm429_vm9 = vcmp.gt.f32.partialorder %v415_v35, %v427_v47 }
 0x3f5   :  { %vm434_vm10 = vmand %vm430_vm7, %vm432_vm4  ;;  %v1728_v35 = vpack.c.bf16 %v633_v33, %v632_v31  ;;  %v1057_v31 = vld [vmem:[#allocation7 + $0x80] sm:$0xff]  ;;  %v1058_v33 = vld [vmem:[#allocation7 + $0x88] sm:$0xff]  ;;  %vm1248_vm7 = vcmask 1040384  }
 0x3f6   :  { %vm435_vm11 = vmand %vm431_vm8, %vm433_vm5 }
 0x3f7   :  { %vm436_vm12 = vmor %vm428_vm6, %vm434_vm10 }
 0x3f8   :  { %vm437_vm13 = vmor %vm429_vm9, %vm435_vm11  ;;  %v1282_v48 = vsel %vm436_vm12, 1.0, %v1951_v0 }
 0x3f9   :  { %v1283_v49 = vsel %vm437_vm13, 1.0, %v1951_v0  ;;  %v442_v50 = vsel %vm180_vm1, %v1282_v48, 0.0 }
 0x3fa   :  { %v443_v51 = vsel %vm180_vm1, %v1283_v49, 0.0 }
 0x3fb   :  { %v444_v52 = vadd.f32 %v443_v51, %v442_v50 }
 0x3fd   :  { %v445_v53 = vrot.slane %v444_v52, 4 }
 0x3ff   :  { %v446_v54 = vadd.f32 %v445_v53, %v444_v52  ;;  %v835_v53 = vld [vmem:[%s2379_s7] sm:$0xff] }
 0x401   :  { %v447_v55 = vrot.slane %v446_v54, 2 }
 0x403   :  { %v448_v56 = vadd.f32 %v447_v55, %v446_v54  ;;  %v836_v54 = vld [vmem:[%s2379_s7 + $0x8] sm:$0xff] }
 0x405   :  { %v449_v57 = vrot.slane %v448_v56, 1 }
 0x407   :  { %v450_v59 = vadd.f32 %v449_v57, %v448_v56  ;;  %v1731_v56 = vpack.c.bf16 %v836_v54, %v835_v53  ;;  %v837_v57 = vld [vmem:[%s2379_s7 + $0x10] sm:$0xff] }
 0x408   :  { %v1096_v53 = vld [vmem:[#allocation7 + $0x1b8] sm:$0xff] }
 0x409   :  { %vm452_vm14 = vcmp.eq.f32.partialorder %v451_v58, %v450_v59  ;;  %v838_v59 = vld [vmem:[%s2379_s7 + $0x18] sm:$0xff] }
 0x40a   :  { %v1284_v60 = vsel %vm452_vm14, 1.0, %v1951_v0 }
 0x40b   :  { %v455_v61 = vmul.f32 %v1284_v60, %v427_v47  ;;  %v529_v62 = vpack.c.bf16 %v1284_v60, %v1284_v60  ;;  %v1734_v60 = vpack.c.bf16 %v838_v59, %v837_v57  ;;  %v1080_v57 = vld [vmem:[#allocation7 + $0x138] sm:$0xff] }
 0x40d   :  { %1538 = vmatmul.mubr.msk.f32.vlgmr.msra.gmra.mrb[2].mxu0 %vm180_vm1, %v455_v61  ;;  %v532_v63 = vsel %vm180_vm1, %v529_v62, 0  ;;  %v839_v61 = vld [vmem:[%s2379_s7 + $0x20] sm:$0xff] }
 0x40e   :  { %1541 = vmatpush3.bf16.msra.mxu0 %v2052_v2  ;;  %1547 = vmatpush3.bf16.xpose.msra.mxu1 %v532_v63  ;;  %v618_v2 = vld [vmem:[%s2376_s4] sm:$0xff] }
 0x40f   :  { %1542 = vmatprep.mubr.msk.bf16.mxu0 %vm1952_vm0, %v1951_v0  ;;  %1706 = vmatprep.subr.bf16.mxu1 %v1955_v9  ;;  %v1707_v6 = vpack.c.bf16 %v619_v4, %v618_v2  ;;  %v842_v2 = vld [vmem:[%s2379_s7 + $0x38] sm:$0xff] }
 0x410   :  { %1587 = vmatprep.subr.bf16.mxu0 %v1951_v0 }
 0x411   :  { %1543 = vmatmul.mubr.msk.bf16.vlgmr.msra.gmra.mrb[4].mxu0 %vm180_vm1, %v529_v62  ;;  %v840_v62 = vld [vmem:[%s2379_s7 + $0x28] sm:$0xff] }
 0x412   :  { %1589 = vmatprep.mubr.msk.bf16.mxu0 %vm1952_vm0, %v1951_v0  ;;  %1588 = vmatpush3.bf16.msra.mxu0 %v712_v36  ;;  %v1737_v63 = vpack.c.bf16 %v840_v62, %v839_v61  ;;  %v1089_v36 = vld [vmem:[#allocation7 + $0x180] sm:$0xff] }
 0x413   :  { %1593 = vmatprep.subr.bf16.mxu0 %v1951_v0 }
 0x4e0   :  { %v2205_v1 = vpop.f32.mrb[2].mxu0 }
 0x4e1   :  { %v1539_v3 = vpop.f32.mrb[3].mxu0 }
 0x4e2   :  { %v841_v3 = vld [vmem:[%s2379_s7 + $0x30] sm:$0xff] }
 0x4e3   :  { %v1740_v4 = vpack.c.bf16 %v842_v2, %v841_v3 }
 0x4e4   :  { %v568_v5 = vpop.f32.mrb[4].mxu0 }
 0x4e5   :  { %v574_v7 = vpack.c.bf16 %v568_v5, %v568_v5  ;;  %v1544_v8 = vpop.f32.mrb[5].mxu0  ;;  %v843_v5 = vld [vmem:[%s2379_s7 + $0x40] sm:$0xff] }
 0x4e6   :  { %v571_v12 = vpop.f32.mrb[6].mxu0  ;;  %v845_v8 = vld [vmem:[%s2379_s7 + $0x50] sm:$0xff] }
 0x4e7   :  { %v1545_v13 = vpop.f32.mrb[7].mxu0  ;;  %1549 = vmatmul.mubr.msk.bf16.vlgmr.msra.gmra.mrb[12].mxu1 %vm180_vm1, %v574_v7  ;;  %vm706_vm1 = vcmask 64512   ;;  %v1746_v11 = vpack.c.bf16 %v846_v10, %v845_v8  ;;  %v847_v12 = vld [vmem:[%s2379_s7 + $0x60] sm:$0xff] }
 0x4e8   :  { %1708 = vmatpush3.bf16.msra.mxu1 %v1707_v6  ;;  %1584 = vmatprep.mubr.msk.f32.mxu1 %vm1952_vm0, %v1951_v0  ;;  %v844_v6 = vld [vmem:[%s2379_s7 + $0x48] sm:$0xff] }
 0x4e9   :  { %1709 = vmatprep.subr.bf16.mxu1 %v1955_v9  ;;  %v1743_v7 = vpack.c.bf16 %v844_v6, %v843_v5  ;;  %v848_v13 = vld [vmem:[%s2379_s7 + $0x68] sm:$0xff]  ;;  %v821_v5 = vrot.slane %v2205_v1, 4 }
 0x4eb   :  { %v828_v8 = vadd.f32 %v821_v5, %v2205_v1 }
 0x4ec   :  { %1711 = vmatpush3.bf16.msra.mxu1 %v1710_v14  ;;  %v1749_v14 = vpack.c.bf16 %v848_v13, %v847_v12 }
 0x4ed   :  { %1712 = vmatprep.subr.bf16.mxu1 %v1955_v9 }
 0x4f0   :  { %1714 = vmatpush3.bf16.msra.mxu1 %v1713_v17  ;;  %v1752_v17 = vpack.c.bf16 %v850_v16, %v849_v15 }
 0x4f1   :  { %1715 = vmatprep.subr.bf16.mxu1 %v1955_v9 }
 0x4f4   :  { %1717 = vmatpush3.bf16.msra.mxu1 %v1716_v20 }
 0x4f5   :  { %1718 = vmatprep.subr.bf16.mxu1 %v1955_v9 }
 0x4f8   :  { %1720 = vmatpush3.bf16.msra.mxu1 %v1719_v23  ;;  %v1290_v23 = vld [vmem:[%s2377_s5] ss:$0 sm:$0xff] }
 0x4f9   :  { %1721 = vmatprep.subr.bf16.mxu1 %v1955_v9 }
 0x4fc   :  { %1723 = vmatpush3.bf16.msra.mxu1 %v1722_v26 }
 0x4fd   :  { %1724 = vmatprep.subr.bf16.mxu1 %v1955_v9 }
 0x500   :  { %1726 = vmatpush3.bf16.msra.mxu1 %v1725_v30 }
 0x501   :  { %1727 = vmatprep.subr.bf16.mxu1 %v1955_v9 }
 0x504   :  { %1729 = vmatpush3.bf16.msra.mxu1 %v1728_v35  ;;  %v1754_v35 = vpack.c.bf16 %v1058_v33, %v1057_v31  ;;  %v1044_v31 = vld [vmem:[#allocation7 + $0x18] sm:$0xff] }
 0x505   :  { %1634 = vmatprep.subr.mxu1 %v1951_v0 }
 0x507   :  { %1585 = vmatmul.mubr.f32.vlgmr.msra.gmra.mrb[10].mxu1 %v2205_v1 }
 0x508   :  { %1636 = vmatprep.mubr.msk.f32.mxu1 %vm1952_vm0, %v1951_v0 }
 0x5ba   :  { %v612_v37 = vpop.f32.mrb[12].mxu1 }
 0x5bb   :  { %v705_v38 = vpack.c.bf16 %v612_v37, %v612_v37  ;;  %v1550_v39 = vpop.f32.mrb[13].mxu1  ;;  %v1090_v37 = vld [vmem:[#allocation7 + $0x188] sm:$0xff] }
 0x5bc   :  { %v615_v40 = vpop.f32.mrb[14].mxu1  ;;  %v1786_v39 = vpack.c.bf16 %v1090_v37, %v1089_v36  ;;  %v1062_v36 = vld [vmem:[#allocation7 + $0xa8] sm:$0xff] }
 0x5bd   :  { %v1551_v41 = vpop.f32.mrb[15].mxu1  ;;  %1590 = vmatmul.mubr.msk.bf16.vlgmr.msra.gmra.mrb[8].mxu0 %vm706_vm1, %v705_v38  ;;  %v1074_v40 = vld [vmem:[#allocation7 + $0x108] sm:$0xff] }
 0x5be   :  { %1595 = vmatprep.mubr.msk.bf16.mxu0 %vm1952_vm0, %v1951_v0  ;;  %v1091_v41 = vld [vmem:[#allocation7 + $0x190] sm:$0xff] }
 0x5da   :  { %v701_v42 = vpop.f32.mrb[10].mxu1 }
 0x5db   :  { %v1586_v43 = vpop.f32.mrb[11].mxu1 }
 0x690   :  { %v748_v44 = vpop.f32.mrb[8].mxu0 }
 0x691   :  { %v749_v45 = vadd.f32 1.0, %v748_v44  ;;  %v1591_v46 = vpop.f32.mrb[9].mxu0 }
 0x692   :  { %v751_v29 = vpop.f32.mrb[10].mxu0  ;;  %v1076_v46 = vld [vmem:[#allocation7 + $0x118] sm:$0xff] }
 0x693   :  { %1842 = vrsqrt.f32 %v749_v45  ;;  %v1592_v47 = vpop.f32.mrb[11].mxu0  ;;  %v1075_v45 = vld [vmem:[#allocation7 + $0x110] sm:$0xff]  ;;  %v1093_v29 = vld [vmem:[#allocation7 + $0x1a0] sm:$0xff] }
 0x694   :  { %v1094_v47 = vld [vmem:[#allocation7 + $0x1a8] sm:$0xff] }
 0x69d   :  { %v1843_v48 = vpop.eup %1842 }
 0x69e   :  { %757 = vperm.xlu0 %1831, %v1843_v48   ;;  %v806_v49 = vmul.f32 %v1843_v48, %v1843_v48  ;;  %v1792_v48 = vpack.c.bf16 %v1076_v46, %v1075_v45  ;;  %v1066_v45 = vld [vmem:[#allocation7 + $0xc8] sm:$0xff] }
 0x6a0   :  { %809 = vperm.xlu1 %1832, %v806_v49   ;;  %v1794_v49 = vpack.c.bf16 %v1094_v47, %v1093_v29  ;;  %v1049_v47 = vld [vmem:[#allocation7 + $0x40] sm:$0xff] }
 0x71d   :  { %v758_v50 = vpop.permute.xlu0 %757 }
 0x71e   :  { %v760_v51 = vmul.f32 %v758_v50, %v701_v42 }
 0x71f   :  { %v810_v18 = vpop.permute.xlu1 %809 }
 0x720   :  { %v761_v52 = vpack.c.bf16 %v760_v51, %v760_v51  ;;  %v812_v20 = vmul.f32 %v810_v18, %v701_v42  ;;  %v1092_v42 = vld [vmem:[#allocation7 + $0x198] sm:$0xff]  ;;  %v1078_v51 = vld [vmem:[#allocation7 + $0x128] sm:$0xff] }
 0x721   :  { %v1790_v44 = vpack.c.bf16 %v1092_v42, %v1091_v41  ;;  %v1047_v42 = vld [vmem:[#allocation7 + $0x30] sm:$0xff] }
 0x722   :  { %v763_v55 = vsel %vm710_vm15, %v761_v52, 0  ;;  %v1095_v52 = vld [vmem:[#allocation7 + $0x1b0] sm:$0xff] }
 0x723   :  { %1594 = vmatpush3.bf16.msra.mxu0 %v763_v55  ;;  %v1798_v55 = vpack.c.bf16 %v1096_v53, %v1095_v52  ;;  %v822_v52 = vmax.f32 %v2205_v1, %v821_v5  ;;  %v1055_v5 = vld [vmem:[#allocation7 + $0x70] sm:$0xff] }
 0x724   :  { %1730 = vmatprep.subr.bf16.mxu0 %v1955_v9 }
 0x726   :  { %1596 = vmatmul.mubr.msk.bf16.vlgmr.msra.gmra.mrb[12].mxu0 %vm706_vm1, %v705_v38  ;;  %v1073_v38 = vld [vmem:[#allocation7 + $0x100] sm:$0xff] }
 0x727   :  { %1732 = vmatpush3.bf16.msra.mxu0 %v1731_v56  ;;  %1631 = vmatprep.mubr.msk.f32.mxu0 %vm1952_vm0, %v1951_v0  ;;  %v1788_v43 = vpack.c.bf16 %v1074_v40, %v1073_v38  ;;  %v1079_v56 = vld [vmem:[#allocation7 + $0x130] sm:$0xff]  ;;  %v1064_v40 = vld [vmem:[#allocation7 + $0xb8] sm:$0xff] }
 0x728   :  { %1733 = vmatprep.subr.bf16.mxu0 %v1955_v9  ;;  %v1800_v59 = vpack.c.bf16 %v1080_v57, %v1079_v56  ;;  %v1069_v56 = vld [vmem:[#allocation7 + $0xe0] sm:$0xff]  ;;  %v1070_v57 = vld [vmem:[#allocation7 + $0xe8] sm:$0xff] }
 0x72b   :  { %1735 = vmatpush3.bf16.msra.mxu0 %v1734_v60 }
 0x72c   :  { %1736 = vmatprep.subr.bf16.mxu0 %v1955_v9 }
 0x72f   :  { %1738 = vmatpush3.bf16.msra.mxu0 %v1737_v63 }
 0x730   :  { %1739 = vmatprep.subr.bf16.mxu0 %v1955_v9 }
 0x733   :  { %1741 = vmatpush3.bf16.msra.mxu0 %v1740_v4 }
 0x734   :  { %1742 = vmatprep.subr.bf16.mxu0 %v1955_v9 }
 0x737   :  { %1744 = vmatpush3.bf16.msra.mxu0 %v1743_v7 }
 0x738   :  { %1745 = vmatprep.subr.bf16.mxu0 %v1955_v9 }
 0x73b   :  { %1747 = vmatpush3.bf16.msra.mxu0 %v1746_v11  ;;  %v829_v11 = vrot.slane %v828_v8, 2 }
 0x73c   :  { %1748 = vmatprep.subr.bf16.mxu0 %v1955_v9 }
 0x73d   :  { %v830_v15 = vadd.f32 %v829_v11, %v828_v8 }
 0x73f   :  { %1750 = vmatpush3.bf16.msra.mxu0 %v1749_v14  ;;  %v831_v18 = vrot.slane %v830_v15, 1 }
 0x740   :  { %1751 = vmatprep.subr.bf16.mxu0 %v1955_v9 }
 0x743   :  { %1753 = vmatpush3.bf16.msra.mxu0 %v1752_v17 }
 0x744   :  { %1787 = vmatprep.subr.bf16.mxu0 %v1786_v39  ;;  %v1045_v39 = vld [vmem:[#allocation7 + $0x20] sm:$0xff] }
 0x7f9   :  { %v799_v19 = vpop.f32.mrb[12].mxu0 }
 0x7fa   :  { %v805_v21 = vmul.f32 %v799_v19, %v758_v50  ;;  %v1597_v22 = vpop.f32.mrb[13].mxu0  ;;  %v1077_v50 = vld [vmem:[#allocation7 + $0x120] sm:$0xff] }
 0x7fb   :  { %v802_v9 = vpop.f32.mrb[14].mxu0  ;;  %v1796_v54 = vpack.c.bf16 %v1078_v51, %v1077_v50  ;;  %v1042_v22 = vld [vmem:[#allocation7 + $0x8] sm:$0xff]  ;;  %v1068_v50 = vld [vmem:[#allocation7 + $0xd8] sm:$0xff] }
 0x7fc   :  { %v813_v24 = vadd.f32 %v812_v20, %v805_v21  ;;  %v1598_v25 = vpop.f32.mrb[15].mxu0  ;;  %v1041_v21 = vld [vmem:[#allocation7] sm:$0xff]  ;;  %v1059_v9 = vld [vmem:[#allocation7 + $0x90] sm:$0xff] }
 0x7fe   :  { %v820_v26 = vadd.f32 %v1290_v23, %v813_v24  ;;  %v832_v23 = vadd.f32 %v831_v18, %v830_v15  ;;  %v1060_v24 = vld [vmem:[#allocation7 + $0x98] sm:$0xff]  ;;  %v1081_v15 = vld [vmem:[#allocation7 + $0x140] sm:$0xff]  ;;  %v1099_v18 = vld [vmem:[#allocation7 + $0x1d0] sm:$0xff] }
 0x800   :  { %1632 = vmatmul.mubr.f32.vlgmr.msra.gmra.mrb[16].mxu0 %v820_v26  ;;  %1635 = vmatpush3.msra.mxu1 %v820_v26  ;;  %v1756_v26 = vpack.c.bf16 %v1042_v22, %v1041_v21  ;;  %v834_v33 = vmul.f32 0.125, %v832_v23  ;;  %v1083_v21 = vld [vmem:[#allocation7 + $0x150] sm:$0xff]  ;;  %v1084_v22 = vld [vmem:[#allocation7 + $0x158] sm:$0xff] }
 0x801   :  { %1755 = vmatprep.subr.bf16.mxu1 %v1754_v35  ;;  %1789 = vmatpush3.bf16.msra.mxu0 %v1788_v43  ;;  %v1061_v35 = vld [vmem:[#allocation7 + $0xa0] sm:$0xff]  ;;  %v1048_v43 = vld [vmem:[#allocation7 + $0x38] sm:$0xff]  ;;  %v1808_v23 = vpack.c.bf16 %v1084_v22, %v1083_v21 }
 0x802   :  { %1791 = vmatprep.subr.bf16.mxu0 %v1790_v44  ;;  %v1762_v38 = vpack.c.bf16 %v1062_v36, %v1061_v35  ;;  %v1065_v44 = vld [vmem:[#allocation7 + $0xc0] sm:$0xff]  ;;  %v1768_v46 = vpack.c.bf16 %v1048_v43, %v1047_v42  ;;  %v1087_v35 = vld [vmem:[#allocation7 + $0x170] sm:$0xff]  ;;  %v1088_v36 = vld [vmem:[#allocation7 + $0x178] sm:$0xff] }
 0x803   :  { %v1770_v29 = vpack.c.bf16 %v1066_v45, %v1065_v44 }
 0x805   :  { %1793 = vmatpush3.bf16.msra.mxu0 %v1792_v48  ;;  %v1050_v48 = vld [vmem:[#allocation7 + $0x48] sm:$0xff] }
 0x806   :  { %1795 = vmatprep.subr.bf16.mxu0 %v1794_v49  ;;  %v1067_v49 = vld [vmem:[#allocation7 + $0xd0] sm:$0xff]  ;;  %v1772_v51 = vpack.c.bf16 %v1050_v48, %v1049_v47 }
 0x807   :  { %v1774_v53 = vpack.c.bf16 %v1068_v50, %v1067_v49 }
 0x809   :  { %1797 = vmatpush3.bf16.msra.mxu0 %v1796_v54  ;;  %v1051_v54 = vld [vmem:[#allocation7 + $0x50] sm:$0xff] }
 0x80a   :  { %1799 = vmatprep.subr.bf16.mxu0 %v1798_v55  ;;  %v1052_v55 = vld [vmem:[#allocation7 + $0x58] sm:$0xff] }
 0x80d   :  { %1801 = vmatpush3.bf16.msra.mxu0 %v1800_v59  ;;  %v1776_v59 = vpack.c.bf16 %v1052_v55, %v1051_v54  ;;  %v1105_v54 = vld [vmem:[%s2381_s9] sm:$0x1]  ;;  %s1956_s9 = smov [#allocation8]  }
 0x80e   :  { %s1268_s16 = sshll.u32 %s1956_s9, 4  ;;  %s1269_s16 = int_to_ptr.vmem [resolvable:$true] %s1268_s16 }
 0x80f   :  { %s1916_s17 = scalar_lea.vmem %s1269_s16, 16  ;;  %s1920_s1 = scalar_lea.vmem %s1269_s16, 32 }
 0x810   :  { %p1917_p10 = scmp.ne.s32.totalorder %s1269_s16, %s1916_s17  ;;  %p1921_p11 = scmp.lt.s32.totalorder %s1269_s16, %s1269_s16 }
 0x811   :  { %p1922_p12 = scmp.lt.s32.totalorder %s1920_s1, %s1916_s17 }
 0x813   :  { %p1923_p13 = por %p1922_p12, %p1921_p11 }
 0x815   :  { %p1924_p0 = pnand %p1923_p13, %p1917_p10 }
 0x8d3   :  { %v917_v27 = vpop.f32.mrb[16].mxu0 }
 0x8d4   :  { %1844 = vtanh.f32 %v917_v27  ;;  %v1633_v28 = vpop.f32.mrb[17].mxu0 }
 0x8d5   :  { %v1758_v28 = vpack.c.bf16 %v1060_v24, %v1059_v9  ;;  %v1101_v9 = vld [vmem:[#allocation7 + $0x1e0] sm:$0xff]  ;;  %v1102_v24 = vld [vmem:[#allocation7 + $0x1e8] sm:$0xff] }
 0x8de   :  { %v1845_v30 = vpop.eup %1844 }
 0x8df   :  { %924 = vperm.xlu0 %1831, %v1845_v30   ;;  %v1043_v30 = vld [vmem:[#allocation7 + $0x10] sm:$0xff] }
 0x8e0   :  { %v1760_v37 = vpack.c.bf16 %v1044_v31, %v1043_v30  ;;  %v1103_v30 = vld [vmem:[#allocation7 + $0x1f0] sm:$0xff]  ;;  %v1104_v31 = vld [vmem:[#allocation7 + $0x1f8] sm:$0xff] }
 0x95e   :  { %v925_v60 = vpop.permute.xlu0 %924 }
 0x95f   :  { %v927_v61 = vsel %vm405_vm3, %v925_v60, 0.0 }
 0x960   :  { %v928_v62 = vsel %vm706_vm1, %v927_v61, 0.0  ;;  %v1778_v61 = vpack.c.bf16 %v1070_v57, %v1069_v56 }
 0x961   :  { %v929_v63 = vrot.slane %v928_v62, 4 }
 0x963   :  { %v930_v3 = vadd.f32 %v929_v63, %v928_v62  ;;  %v1053_v62 = vld [vmem:[#allocation7 + $0x60] sm:$0xff]  ;;  %v1054_v63 = vld [vmem:[#allocation7 + $0x68] sm:$0xff] }
 0x965   :  { %v931_v2 = vrot.slane %v930_v3, 2 }
 0x967   :  { %v932_v4 = vadd.f32 %v931_v2, %v930_v3  ;;  %v1071_v3 = vld [vmem:[#allocation7 + $0xf0] sm:$0xff]  ;;  %v1072_v2 = vld [vmem:[#allocation7 + $0xf8] sm:$0xff] }
 0x968   :  { %v1782_v1 = vpack.c.bf16 %v1072_v2, %v1071_v3 }
 0x969   :  { %v933_v6 = vrot.slane %v932_v4, 1 }
 0x96b   :  { %v934_v7 = vadd.f32 %v933_v6, %v932_v4  ;;  %v1780_v4 = vpack.c.bf16 %v1054_v63, %v1053_v62 }
 0x96d   :  { %vm935_vm0 = vcmp.gt.f32.partialorder %v925_v60, %v934_v7  ;;  %vm936_vm2 = vcmp.eq.f32.partialorder %v925_v60, %v934_v7  ;;  %v823_v60 = vrot.slane %v822_v52, 2 }
 0x96e   :  { %vm937_vm5 = vmand %vm936_vm2, %vm432_vm4  ;;  %vm1246_vm4 = vcmp.lt.s32.totalorder %v2171_v34, 4 }
 0x96f   :  { %vm938_vm6 = vmor %vm935_vm0, %vm937_vm5  ;;  %v824_v6 = vmax.f32 %v822_v52, %v823_v60 }
 0x970   :  { %v1291_v10 = vsel %vm938_vm6, 1.0, %v1951_v0 }
 0x971   :  { %v941_v12 = vsel %vm706_vm1, %v1291_v10, 0.0  ;;  %v825_v10 = vrot.slane %v824_v6, 1 }
 0x972   :  { %v942_v13 = vrot.slane %v941_v12, 4 }
 0x973   :  { %v826_v11 = vmax.f32 %v824_v6, %v825_v10 }
 0x974   :  { %v943_v14 = vadd.f32 %v942_v13, %v941_v12  ;;  %v1097_v12 = vld [vmem:[#allocation7 + $0x1c0] sm:$0xff]  ;;  %v1098_v13 = vld [vmem:[#allocation7 + $0x1c8] sm:$0xff] }
 0x976   :  { %v944_v16 = vrot.slane %v943_v14, 2 }
 0x978   :  { %v945_v17 = vadd.f32 %v944_v16, %v943_v14  ;;  %v1802_v14 = vpack.c.bf16 %v1098_v13, %v1097_v12  ;;  %v1082_v16 = vld [vmem:[#allocation7 + $0x148] sm:$0xff] }
 0x97a   :  { %v946_v19 = vrot.slane %v945_v17, 1  ;;  %1803 = vmatprep.subr.bf16.mxu0 %v1802_v14 }
 0x97c   :  { %v947_v20 = vadd.f32 %v946_v19, %v945_v17  ;;  %v1804_v17 = vpack.c.bf16 %v1082_v16, %v1081_v15  ;;  %v1100_v19 = vld [vmem:[#allocation7 + $0x1d8] sm:$0xff] }
 0x97e   :  { %vm948_vm3 = vcmp.eq.f32.partialorder %v451_v58, %v947_v20  ;;  %v1063_v58 = vld [vmem:[#allocation7 + $0xb0] sm:$0xff]  ;;  %1805 = vmatpush3.bf16.msra.mxu0 %v1804_v17  ;;  %v1806_v20 = vpack.c.bf16 %v1100_v19, %v1099_v18 }
 0x97f   :  { %v1292_v25 = vsel %vm948_vm3, 1.0, %v1951_v0  ;;  %v1764_v0 = vpack.c.bf16 %v1046_v32, %v1045_v39  ;;  %v1766_v41 = vpack.c.bf16 %v1064_v40, %v1063_v58 }
 0x980   :  { %v951_v27 = vmul.f32 %v1292_v25, %v934_v7  ;;  %v1056_v7 = vld [vmem:[#allocation7 + $0x78] sm:$0xff]  ;;  %1807 = vmatprep.subr.bf16.mxu0 %v1806_v20  ;;  %v1810_v25 = vpack.c.bf16 %v1102_v24, %v1101_v9 }
 0x981   :  { %v1784_v8 = vpack.c.bf16 %v1056_v7, %v1055_v5 }
 0x982   :  { %1637 = vmatmul.mubr.msk.f32.vlgmr.msra.gmra.mrb[16].mxu1 %vm706_vm1, %v951_v27  ;;  %1809 = vmatpush3.bf16.msra.mxu0 %v1808_v23  ;;  %v1086_v27 = vld [vmem:[#allocation7 + $0x168] sm:$0xff] }
 0x983   :  { %1757 = vmatpush3.bf16.msra.mxu1 %v1756_v26  ;;  %1170 = vmatprep.mubr.f32.mxu1 %v834_v33  ;;  %v1085_v26 = vld [vmem:[#allocation7 + $0x160] sm:$0xff]  ;;  %v1814_v33 = vpack.c.bf16 %v1104_v31, %v1103_v30 }
 0x984   :  { %1759 = vmatprep.subr.bf16.mxu1 %v1758_v28  ;;  %v1812_v28 = vpack.c.bf16 %v1086_v27, %v1085_v26  ;;  %1811 = vmatprep.subr.bf16.mxu0 %v1810_v25 }
 0x986   :  { %1813 = vmatpush3.bf16.msra.mxu0 %v1812_v28 }
 0x987   :  { %1761 = vmatpush3.bf16.msra.mxu1 %v1760_v37  ;;  %v1816_v37 = vpack.c.bf16 %v1088_v36, %v1087_v35  ;;  %1815 = vmatprep.subr.bf16.mxu0 %v1814_v33 }
 0x988   :  { %1763 = vmatprep.subr.bf16.mxu1 %v1762_v38 }
 0x98a   :  { %1817 = vmatpush3.bf16.msra.mxu0 %v1816_v37 }
 0x98b   :  { %1765 = vmatpush3.bf16.msra.mxu1 %v1764_v0 }
 0x98c   :  { %1767 = vmatprep.subr.bf16.mxu1 %v1766_v41 }
 0x98f   :  { %1769 = vmatpush3.bf16.msra.mxu1 %v1768_v46 }
 0x990   :  { %1771 = vmatprep.subr.bf16.mxu1 %v1770_v29 }
 0x993   :  { %1773 = vmatpush3.bf16.msra.mxu1 %v1772_v51 }
 0x994   :  { %1775 = vmatprep.subr.bf16.mxu1 %v1774_v53 }
 0x997   :  { %1777 = vmatpush3.bf16.msra.mxu1 %v1776_v59 }
 0x998   :  { %1779 = vmatprep.subr.bf16.mxu1 %v1778_v61 }
 0x99b   :  { %1781 = vmatpush3.bf16.msra.mxu1 %v1780_v4 }
 0x99c   :  { %1783 = vmatprep.subr.bf16.mxu1 %v1782_v1 }
 0x99f   :  { %1785 = vmatpush3.bf16.msra.mxu1 %v1784_v8 }
 0x9a2   :  { %1171 = vmatmul.mubr.f32.vlgmr.msra.gmra.mrb[18].mxu1 %v826_v11 }
 0xa55   :  { %v1021_v38 = vpop.f32.mrb[16].mxu1 }
 0xa56   :  { %v1025_v39 = vsel %vm710_vm15, %v1021_v38, -inf  ;;  %v1032_v32 = vsel %vm710_vm15, %v1021_v38, 0.0  ;;  %v1638_v58 = vpop.f32.mrb[17].mxu1 }
 0xa57   :  { %v1026_v40 = vrot.slane %v1025_v39, 4  ;;  %v1033_v0 = vrot.slane %v1032_v32, 4 }
 0xa59   :  { %v1027_v41 = vmax.f32 %v1025_v39, %v1026_v40  ;;  %v1034_v42 = vadd.f32 %v1033_v0, %v1032_v32 }
 0xa5b   :  { %v1028_v43 = vrot.slane %v1027_v41, 2  ;;  %v1035_v44 = vrot.slane %v1034_v42, 2 }
 0xa5d   :  { %v1029_v45 = vmax.f32 %v1027_v41, %v1028_v43  ;;  %v1036_v46 = vadd.f32 %v1035_v44, %v1034_v42 }
 0xa5f   :  { %v1037_v29 = vrot.slane %v1036_v46, 1  ;;  %v1030_v47 = vrot.slane %v1029_v45, 1 }
 0xa61   :  { %v1038_v48 = vadd.f32 %v1037_v29, %v1036_v46  ;;  %v1031_v50 = vmax.f32 %v1029_v45, %v1030_v47 }
 0xa63   :  { %v1040_v49 = vmul.f32 0.25, %v1038_v48 }
 0xa65   :  { %1240 = vmatprep.mubr.f32.mxu0 %v1040_v49 }
 0xa66   :  { %1241 = vmatmul.mubr.f32.vlgmr.msra.gmra.mrb[18].mxu0 %v1031_v50 }
 0xa75   :  { %v1413_v51 = vpop.f32.mrb[18].mxu1 }
 0xa76   :  { %v1414_v52 = vpop.f32.mrb[19].mxu1 }
 0xa77   :  { %v1415_v53 = vadd.f32 %v1414_v52, %v1413_v51 }
 0xa79   :  { %v1173_v57 = vadd.f32 %v1415_v53, %v1105_v54 }
 0xb39   :  { %v1448_v55 = vpop.f32.mrb[18].mxu0 }
 0xb3a   :  { %v1449_v56 = vpop.f32.mrb[19].mxu0 }
 0xb3b   :  { %v1450_v59 = vadd.f32 %v1449_v56, %v1448_v55 }
 0xb3d   :  { %v1243_v60 = vadd.f32 %v1450_v59, %v1173_v57 }
 0xb3f   :  { %v1247_v61 = vsel %vm1246_vm4, %v1243_v60, -1e+30 }
 0xb40   :  { %v1249_v62 = vsel %vm1248_vm7, %v1247_v61, -inf }
 0xb41   :  { %1250 = vmax.xlane.f32.xlu1 %v1249_v62 }
 0xbce   :  { %v1251_v63 = vpop.xlane.xlu1 %1250 }
 0xbcf   :  { %v1252_v3 = vsub.f32 %v1247_v61, %v1251_v63 }
 0xbd1   :  { %v1253_v2 = vmul.f32 1.442695, %v1252_v3 }
 0xbd3   :  { %1846 = vpow2.f32 %v1253_v2 }
 0xbdd   :  { %v1847_v4 = vpop.eup %1846 }
 0xbde   :  { %v1255_v6 = vsel %vm1248_vm7, %v1847_v4, 0.0 }
 0xbdf   :  { %1256 = vadd.xlane.f32.xlu0 %v1255_v6 }
 0xc6c   :  { %v1257_v1 = vpop.xlane.xlu0 %1256 }
 0xc6d   :  { %1848 = vlog2.f32 %v1257_v1 }
 0xc77   :  { %v1849_v5 = vpop.eup %1848 }
 0xc78   :  { %v1259_v7 = vmul.f32 0.6931472, %v1849_v5 }
 0xc7a   :  { %v1260_v8 = vsub.f32 %v1252_v3, %v1259_v7 }
 0xc7c   :  { %1261 = vst [vmem:[#allocation8] sm:$0x1] %v1260_v8 }
 0xc7d   :  { %1927 = shalt.err (!%p1924_p0)
}
 0xc7e   :  { %s1928_s18 = scalar_lea.hbm %s2382_s10, 16 }
 0xc7f   :  { %p1929_p1 = scmp.ne.s32.totalorder %s2382_s10, %s1928_s18  ;;  %p1932_p2 = scmp.lt.u32.totalorder %s1928_s18, %s2382_s10 }
 0xc81   :  { %p1934_p3 = pnand %p1932_p2, %p1929_p1 }
 0xc83   :  { %1937 = shalt.err (!%p1934_p3)
}
 0xc84   :  { %1271 = dma.vmem_to_hbm [thread:$0]  %s1269_s16, 16, %s2382_s10, [#allocation4]  }
 0xc85   :  { %1942 = dma.done.wait [#allocation4], 16  }
 0xc86   :  { %1943 = vsyncadd [#allocation4], 4294967280 }
 0xc87   :  { %1275 = vsyncpa [#allocation3], 1 }
 0xc88   :  { %1276 = vsyncpa [#allocation6], 1 }
 0xc89   :  { %1277 = vsyncpa [#allocation4], 1 }

</bundles_post_ra>
